<compile_context>
chip_gen: v5e
topology: v5e:2x2
jax: 0.10.0
libtpu: 0.0.40
codegen_flags: <defaults>
</compile_context>

<pallas_src>
import jax
import jax.numpy as jnp
from jax.experimental import pallas as pl
from jax.experimental.pallas import tpu as pltpu


def _normalizer_kernel(mean_ref, inv_std_ref, x_ref, o_ref):
    # mean_ref / inv_std_ref: (block_rows, 1) f32 tiles, lane-broadcast.
    # x_ref / o_ref:          (block_rows, block_cols) tiles.
    x = x_ref[...].astype(jnp.float32)
    o_ref[...] = ((x - mean_ref[...]) * inv_std_ref[...]).astype(o_ref.dtype)


def _round_up(x, m):
    return ((x + m - 1) // m) * m


def _largest_dividing_tile(dim, granule, cap):
    """Largest multiple of `granule` that divides `dim` and is <= cap.

    `dim` must already be a multiple of `granule`, so `granule` always works.
    """
    best = granule
    t = granule
    limit = min(dim, cap)
    while t <= limit:
        if dim % t == 0:
            best = t
        t += granule
    return best


def _tile_byte_budget():
    """Per-buffer VMEM tile byte budget, chosen by TPU generation."""
    try:
        kind = jax.devices()[0].device_kind.lower()
    except Exception:
        kind = ""
    if "v6" in kind or "v7" in kind:
        return 4 << 20   # 32 MiB scoped-VMEM default -> 4 MiB tiles amortize step overhead
    return 2 << 20       # v5e & older / unknown: double-buffered footprint stays < 16 MiB


def _choose_tiling(R, L, itemsize, byte_budget):
    """Return (R_pad, L_pad, block_rows, block_cols).

    Lanes grow first (full contiguous rows when the budget allows), rows fill
    the remaining budget. Unaligned dims are padded instead of falling back to
    sub-128 (masked-store) or full-extent (VMEM-blowup) blocks.
    """
    row_granule = {4: 8, 2: 16, 1: 32}.get(itemsize, 8)
    lane_granule = 128
    elem_budget = max(byte_budget // itemsize, row_granule * lane_granule)

    # --- lane (last) axis: prefer a full, contiguous row ---
    L_pad = _round_up(L, lane_granule)
    cap_cols = max(lane_granule,
                   (elem_budget // row_granule) // lane_granule * lane_granule)
    if L_pad <= cap_cols:
        block_cols = L_pad
    else:
        block_cols = _largest_dividing_tile(L_pad, lane_granule, cap_cols)
        # Poor divisor -> pad lanes up to a budget-sized block when the
        # padding overhead stays small.
        if block_cols * 4 < cap_cols and _round_up(L, cap_cols) - L <= L // 4:
            block_cols = cap_cols
            L_pad = _round_up(L, block_cols)

    # --- row (sublane) axis: fill the remaining byte budget ---
    cap_rows = max(row_granule,
                   (elem_budget // block_cols) // row_granule * row_granule)
    R_pad = _round_up(R, row_granule)
    if R_pad <= cap_rows:
        block_rows = R_pad
    else:
        block_rows = _largest_dividing_tile(R_pad, row_granule, cap_rows)
        if block_rows * 4 < cap_rows and _round_up(R, cap_rows) - R <= R // 4:
            block_rows = cap_rows
            R_pad = _round_up(R, block_rows)

    # --- v7x megacore: keep >=2 steps on the leading parallel axis when the
    #     whole problem would otherwise be a single block (zero-waste split). ---
    if (R_pad == block_rows and L_pad == block_cols
            and R_pad >= 2 * row_granule and (R_pad // row_granule) % 2 == 0):
        block_rows = R_pad // 2

    return R_pad, L_pad, block_rows, block_cols


def normalize(x, mean, std):
    """(x - mean[None,:,None,None]) / std[None,:,None,None] for NCHW x."""
    N, C, H, W = x.shape
    R, L = N * C, H * W
    itemsize = jnp.dtype(x.dtype).itemsize

    R_pad, L_pad, block_rows, block_cols = _choose_tiling(
        R, L, itemsize, _tile_byte_budget())
    grid = (R_pad // block_rows, L_pad // block_cols)

    # Lane-dense 2-D view, padded to the chosen tiling.
    x2 = x.reshape(R, L)
    if (R_pad, L_pad) != (R, L):
        x2 = jnp.pad(x2, ((0, R_pad - R), (0, L_pad - L)))

    # Row-expanded per-(n, c) parameters; inv_std via an exact f32 divide so
    # (x - m) * inv_s stays within ~1 ulp of (x - m) / s.
    mean_f32 = jnp.asarray(mean, dtype=jnp.float32).reshape(1, C)
    inv_std_f32 = 1.0 / jnp.asarray(std, dtype=jnp.float32).reshape(1, C)
    mean_rows = jnp.broadcast_to(mean_f32, (N, C)).reshape(R, 1)
    inv_std_rows = jnp.broadcast_to(inv_std_f32, (N, C)).reshape(R, 1)
    if R_pad != R:
        mean_rows = jnp.pad(mean_rows, ((0, R_pad - R), (0, 0)))
        inv_std_rows = jnp.pad(inv_std_rows, ((0, R_pad - R), (0, 0)),
                               constant_values=1.0)

    total = R_pad * L_pad
    cost = pl.CostEstimate(
        flops=2 * total,                                   # sub + mul per element
        transcendentals=0,
        bytes_accessed=2 * total * itemsize + 2 * R_pad * 4,
    )

    out2 = pl.pallas_call(
        _normalizer_kernel,
        out_shape=jax.ShapeDtypeStruct((R_pad, L_pad), x.dtype),
        grid=grid,
        in_specs=[
            pl.BlockSpec((block_rows, 1), lambda i, j: (i, 0)),           # mean rows
            pl.BlockSpec((block_rows, 1), lambda i, j: (i, 0)),           # inv_std rows
            pl.BlockSpec((block_rows, block_cols), lambda i, j: (i, j)),  # x
        ],
        out_specs=pl.BlockSpec((block_rows, block_cols), lambda i, j: (i, j)),
        compiler_params=pltpu.CompilerParams(
            dimension_semantics=("parallel", "parallel")),
        cost_estimate=cost,
    )(mean_rows, inv_std_rows, x2)

    if (R_pad, L_pad) != (R, L):
        out2 = out2[:R, :L]
    return out2.reshape(N, C, H, W)


if __name__ == "__main__":
    # Small shapes consistent with the module's NCHW convention.
    N, C, H, W = 2, 4, 16, 16

    key = jax.random.PRNGKey(0)
    kx, km, ks = jax.random.split(key, 3)

    x = jax.random.normal(kx, (N, C, H, W), dtype=jnp.float32)
    # The module stores mean/std buffers of shape (1, C, 1, 1); we keep them
    # flat (C,) and expand in the wrapper.
    mean = jax.random.uniform(km, (C,), dtype=jnp.float32, minval=0.3, maxval=0.6)
    std = jax.random.uniform(ks, (C,), dtype=jnp.float32, minval=0.2, maxval=0.3)

    out = jax.block_until_ready(normalize(x, mean, std))

    # Pure-JAX reference matching PyTorch semantics.
    ref = (x - mean.reshape(1, C, 1, 1)) / std.reshape(1, C, 1, 1)
    assert out.shape == x.shape and out.dtype == x.dtype
    assert jnp.allclose(out, ref, atol=1e-6, rtol=1e-6)

    print("KERNEL_OK")
</pallas_src>

<mosaic_0001>
module attributes {stable_mosaic.version = 11 : i64} {
  func.func @_normalizer_kernel(%arg0: i32, %arg1: i32, %arg2: memref<8x1xf32, #tpu.memory_space<vmem>>, %arg3: memref<8x1xf32, #tpu.memory_space<vmem>>, %arg4: memref<8x256xf32, #tpu.memory_space<vmem>>, %arg5: memref<8x256xf32, #tpu.memory_space<vmem>>) attributes {dimension_semantics = [#tpu.dimension_semantics<parallel>, #tpu.dimension_semantics<parallel>], iteration_bounds = array<i64: 1, 1>, scalar_prefetch = 0 : i64, scratch_operands = 0 : i64, tpu.core_type = #tpu.core_type<tc>, window_params = [{transform_indices = @transform_0, window_bounds = array<i64: 8, 1>}, {transform_indices = @transform_1, window_bounds = array<i64: 8, 1>}, {transform_indices = @transform_2, window_bounds = array<i64: 8, 256>}, {transform_indices = @transform_3, window_bounds = array<i64: 8, 256>}]} {
    %c0 = arith.constant 0 : index
    %c0_0 = arith.constant 0 : index
    %0 = vector.load %arg4[%c0, %c0_0] : memref<8x256xf32, #tpu.memory_space<vmem>>, vector<8x256xf32>
    %c0_1 = arith.constant 0 : index
    %c0_2 = arith.constant 0 : index
    %1 = vector.load %arg2[%c0_1, %c0_2] : memref<8x1xf32, #tpu.memory_space<vmem>>, vector<8x1xf32>
    %2 = vector.broadcast %1 : vector<8x1xf32> to vector<8x256xf32>
    %3 = arith.subf %0, %2 : vector<8x256xf32>
    %c0_3 = arith.constant 0 : index
    %c0_4 = arith.constant 0 : index
    %4 = vector.load %arg3[%c0_3, %c0_4] : memref<8x1xf32, #tpu.memory_space<vmem>>, vector<8x1xf32>
    %5 = vector.broadcast %4 : vector<8x1xf32> to vector<8x256xf32>
    %6 = arith.mulf %3, %5 : vector<8x256xf32>
    %c0_5 = arith.constant 0 : index
    %c0_6 = arith.constant 0 : index
    %7 = vector.load %arg5[%c0_5, %c0_6] : memref<8x256xf32, #tpu.memory_space<vmem>>, vector<8x256xf32>
    tpu.vector_store %arg5[%c0_5, %c0_6], %6 {strides = array<i32>} : memref<8x256xf32, #tpu.memory_space<vmem>>, vector<8x256xf32>,
    return
  }
  func.func @transform_0(%arg0: i32, %arg1: i32) -> (i32, i32) {
    %c0_i32 = arith.constant 0 : i32
    %c0_i32_0 = arith.constant 0 : i32
    return %arg0, %c0_i32 : i32, i32
  }
  func.func @transform_1(%arg0: i32, %arg1: i32) -> (i32, i32) {
    %c0_i32 = arith.constant 0 : i32
    %c0_i32_0 = arith.constant 0 : i32
    return %arg0, %c0_i32 : i32, i32
  }
  func.func @transform_2(%arg0: i32, %arg1: i32) -> (i32, i32) {
    %c0_i32 = arith.constant 0 : i32
    return %arg0, %arg1 : i32, i32
  }
  func.func @transform_3(%arg0: i32, %arg1: i32) -> (i32, i32) {
    %c0_i32 = arith.constant 0 : i32
    return %arg0, %arg1 : i32, i32
  }
}

</mosaic_0001>

<bundles_post_ra>
// kernel: tpu_custom_call.1
= control target key start
LH: loop header
LB: loop body
LE: loop exit
PB: predicated region body
PF: predicated region fallthrough
CT: control target
= control target key end

     0   :  { %s117_s0 = inlined_call_operand.vmem [shape: f32[8,1], index: 0, kind: input, shape index: {}]   ;;  %s118_s1 = inlined_call_operand.vmem [shape: f32[8,1], index: 1, kind: input, shape index: {}]   ;;  %s119_s2 = inlined_call_operand.vmem [shape: f32[8,256], index: 2, kind: input, shape index: {}]   ;;  %s120_s3 = inlined_call_operand.hbm [shape: f32[8,256], index: 3, kind: output, shape index: {}]  }
   0x1   :  { %v17_v0 = vld [vmem:[%s117_s0] sm:$0xff] }
   0x2   :  { %8 = vsyncpa [#allocation3], 0  ;;  %v80_v1 = vmov 0   ;;  %v25_v2 = vld [vmem:[%s118_s1] sm:$0xff]  ;;  %v16_v5 = vld [vmem:[%s119_s2 + $0x8] sm:$0xff]  ;;  %s81_s0 = smov [#allocation2]  }
   0x3   :  { %53 = vset.pattern.permute.xlu0 %v80_v1  ;;  %v15_v4 = vld [vmem:[%s119_s2] sm:$0xff]  ;;  %s40_s20 = sshll.u32 %s81_s0, 4  ;;  %s42_s23 = sshll.u32 %s120_s3, 4  ;;  %s41_s20 = int_to_ptr.vmem [resolvable:$true] %s40_s20  ;;  %s43_s23 = int_to_ptr.hbm [resolvable:$true] %s42_s23 }
   0x4   :  { %20 = vperm.xlu0 %53, %v17_v0  }
   0xc   :  { %28 = vperm.xlu0 %53, %v25_v2  }
  0x76   :  { %v21_v3 = vpop.permute.xlu0 %20 }
  0x77   :  { %v23_v6 = vsub.f32 %v15_v4, %v21_v3  ;;  %v24_v7 = vsub.f32 %v16_v5, %v21_v3 }
  0x7e   :  { %v29_v8 = vpop.permute.xlu0 %28 }
  0x7f   :  { %v31_v9 = vmul.f32 %v29_v8, %v23_v6  ;;  %v32_v10 = vmul.f32 %v29_v8, %v24_v7 }
  0x81   :  { %33 = vst [vmem:[#allocation2] sm:$0xff] %v31_v9 }
  0x82   :  { %34 = vst [vmem:[#allocation2 + $0x8] sm:$0xff] %v32_v10 }
  0x83   :  { %45 = dma.vmem_to_hbm [thread:$0]  %s41_s20, 256, %s43_s23, [#allocation3]  }
  0x84   :  { %78 = dma.done.wait [#allocation3], 256  }
  0x85   :  { %79 = vsyncadd [#allocation3], 4294967040 }
  0x86   :  { %50 = vsyncpa [#allocation3], 1 }

</bundles_post_ra>
